<compile_context>
chip_gen: v7x
topology: tpu7x:2x2x1
jax: 0.10.0
libtpu: 0.0.40
codegen_flags: <defaults>
</compile_context>

<pallas_src>
import functools
import math

import jax
import jax.numpy as jnp
from jax.experimental import pallas as pl
from jax.experimental.pallas import tpu as pltpu


def _round_up(n, m):
    return ((n + m - 1) // m) * m


def _label_smoothing_kernel(x_ref, tgt_ref, out_ref, acc_ref, *, base,
                            confidence, padding_idx, vocab_size, vt,
                            mask_cols, const_term, use_mxu):
    j = pl.program_id(1)              # vocab (reduction) axis -- last grid axis

    @pl.when(j == 0)
    def _init():
        acc_ref[...] = jnp.zeros_like(acc_ref)

    x = x_ref[...]                    # (rt, vt) in input dtype (bf16 or f32)
    tgt = tgt_ref[...]                # (rt, 1) int32
    col = jax.lax.broadcasted_iota(jnp.int32, x.shape, 1)  # local column ids

    if mask_cols:
        # Partial last vocab tile: mask x itself with a select (NOT a multiply)
        # so Inf/NaN garbage in the unwritten VMEM region cannot poison sums.
        valid = (col + j * vt) < vocab_size
        x = jnp.where(valid, x, jnp.zeros_like(x))

    # One-hot pick of the target column; rows whose target lives in another
    # vocab tile contribute 0 on this step.
    tgt_local = tgt - j * vt
    picked = jnp.where(col == tgt_local, x, jnp.zeros_like(x))

    if use_mxu:
        # bf16 path: row sums on the otherwise-idle MXU.  Every output lane
        # holds the same row sum; accumulation is f32.
        ones = jnp.ones((x.shape[1], 128), dtype=x.dtype)
        t_part = jnp.dot(picked, ones, preferred_element_type=jnp.float32)
        contrib = (base - confidence) * t_part
        if base != 0.0:
            s_part = jnp.dot(x, ones, preferred_element_type=jnp.float32)
            contrib = contrib - base * s_part
    else:
        # f32 path: exact VPU/XLU row sums (kernel is HBM-bound at 4 B/elem).
        t_part = jnp.sum(picked.astype(jnp.float32), axis=1, keepdims=True)
        contrib = (base - confidence) * t_part
        if base != 0.0:
            s_part = jnp.sum(x.astype(jnp.float32), axis=1, keepdims=True)
            contrib = contrib - base * s_part

    acc_ref[...] += contrib           # (rt,128) resident f32 accumulator

    if base != 0.0:
        # The padding column's true coefficient is 0, not -base: add it back
        # on the single vocab step that contains that column.
        j_pad = padding_idx // vt
        p_loc = padding_idx % vt

        @pl.when(j == j_pad)
        def _pad_col():
            xp = x[:, p_loc:p_loc + 1].astype(jnp.float32)   # (rt, 1)
            acc_ref[...] += base * xp

    @pl.when(j == pl.num_programs(1) - 1)
    def _finalize():
        # Rows with target == padding_idx (incl. rows padded to a full row
        # tile) are zeroed here; select does not propagate NaN/Inf from the
        # discarded operand, so garbage rows cannot leak into the loss.
        keep = tgt != padding_idx
        total = acc_ref[:, 0:1] + jnp.float32(const_term)
        out_ref[...] = jnp.where(keep, total, jnp.float32(0.0))


def label_smoothing_loss(x, target, *, vocab_size, padding_idx, smoothing=0.0,
                         row_tile=512, vocab_tile=8192):
    """x: (N, vocab_size) log-probs (f32 or bf16), target: (N,) int.
    Returns scalar f32 == nn.KLDivLoss(size_average=False)(x, true_dist)."""
    N, V = x.shape
    assert V == vocab_size
    if smoothing > 0.0:
        assert vocab_size > 2, "smoothing > 0 requires vocab_size > 2"
    confidence = 1.0 - smoothing
    base = (smoothing / (vocab_size - 2)) if smoothing > 0.0 else 0.0

    # Constant term folded at trace time (0*log(0) := 0, like the td>0 guard).
    const_term = 0.0
    if base > 0.0:
        const_term += smoothing * math.log(base)      # = base*(V-2)*log(base)
    if confidence > 0.0:
        const_term += confidence * math.log(confidence)

    itemsize = jnp.dtype(x.dtype).itemsize
    use_mxu = jnp.dtype(x.dtype) == jnp.dtype(jnp.bfloat16)

    # ---- generation-aware VMEM budget (v7x: 64 MiB/TC, v5e/v6e: 128 MiB) ---
    vmem_cap = 64 * 1024 * 1024                       # conservative default
    try:
        info = pltpu.get_tpu_info()
        for name in ("vmem_capacity_bytes", "vmem_bytes", "vmem_size_bytes"):
            v = getattr(info, name, None)
            if isinstance(v, (int, float)) and v > 0:
                vmem_cap = int(v)
                break
    except Exception:
        pass
    if vmem_cap >= 96 * 1024 * 1024:                  # v5e / v6e (128 MiB)
        vmem_limit = 96 * 1024 * 1024
    else:                                             # v7x: leave headroom
        vmem_limit = 48 * 1024 * 1024

    # ---- row tiling: prefer an even number of row tiles (v7x has 2 TCs) ----
    rt = max(8, _round_up(min(int(row_tile), _round_up(N, 8)), 8))
    grid_r = pl.cdiv(N, rt)
    if grid_r % 2 == 1:
        rt_try = _round_up(pl.cdiv(N, grid_r + 1), 8)
        if rt_try >= 8 and pl.cdiv(N, rt_try) % 2 == 0:
            rt = rt_try
            grid_r = pl.cdiv(N, rt)
    n_pad = grid_r * rt

    # ---- vocab tiling: biggest lane tile that fits the VMEM budget ---------
    # Conservative per-element VMEM bytes: double-buffered input block + i32
    # iota + compare mask + selected copy (headroom covers the ones matrix).
    per_elem = 3 * itemsize + 12
    max_elems = (7 * vmem_limit // 10) // per_elem
    max_vt = max(128, ((max_elems // rt) // 128) * 128)
    vt_cap = min(max_vt, max(128, _round_up(int(vocab_tile), 128)))
    if V <= vt_cap:
        vt = V                        # whole vocab per step: no column mask
    else:
        vt = vt_cap
        # Prefer a vt that divides V -> no partial last tile, no masking.
        for cand in range(vt, max(vt // 2, 128) - 1, -128):
            if V % cand == 0:
                vt = cand
                break
    grid_v = pl.cdiv(V, vt)
    mask_cols = (grid_v * vt != V)

    tgt = target.astype(jnp.int32).reshape(N, 1)
    if n_pad != N:   # pad targets with padding_idx so padded rows mask to 0
        tgt = jnp.pad(tgt, ((0, n_pad - N), (0, 0)),
                      constant_values=padding_idx)

    kernel = functools.partial(
        _label_smoothing_kernel,
        base=float(base), confidence=float(confidence),
        padding_idx=int(padding_idx), vocab_size=int(V), vt=int(vt),
        mask_cols=bool(mask_cols), const_term=float(const_term),
        use_mxu=bool(use_mxu))

    per_row = pl.pallas_call(
        kernel,
        out_shape=jax.ShapeDtypeStruct((n_pad, 1), jnp.float32),
        grid_spec=pltpu.PrefetchScalarGridSpec(
            num_scalar_prefetch=0,
            grid=(grid_r, grid_v),                   # reduction (vocab) last
            in_specs=[
                pl.BlockSpec((rt, vt), lambda i, j: (i, j)),
                pl.BlockSpec((rt, 1), lambda i, j: (i, 0)),
            ],
            out_specs=pl.BlockSpec((rt, 1), lambda i, j: (i, 0)),
            scratch_shapes=[pltpu.VMEM((rt, 128), jnp.float32)],
        ),
        compiler_params=pltpu.CompilerParams(
            dimension_semantics=("parallel", "arbitrary"),
            vmem_limit_bytes=int(vmem_limit)),
    )(x, tgt)

    # Tiny final reduce in XLA (tree reduce over the per-row losses).
    return jnp.sum(per_row)


def _reference_loss(x, target, *, vocab_size, padding_idx, smoothing):
    """Pure-JAX reference of the PyTorch LabelSmoothing forward."""
    conf = 1.0 - smoothing
    base = smoothing / (vocab_size - 2) if smoothing > 0.0 else 0.0
    n = x.shape[0]
    td = jnp.full((n, vocab_size), base, jnp.float32)
    td = td.at[jnp.arange(n), target].set(conf)
    td = td.at[:, padding_idx].set(0.0)
    td = jnp.where((target == padding_idx)[:, None], 0.0, td)
    x32 = x.astype(jnp.float32)
    return jnp.sum(jnp.where(td > 0, td * (jnp.log(td) - x32), 0.0))


if __name__ == "__main__":
    # TODO(synk): the module also stores self.true_dist as a side effect; the
    # kernel computes the loss in closed form and never materializes it.
    key = jax.random.PRNGKey(0)

    # --- Case 1: small shapes consistent with the module (f32 path) --------
    batch, outlen, vocab_size = 2, 8, 128
    padding_idx, smoothing = 0, 0.1
    N = batch * outlen
    k_x, k_t = jax.random.split(key)
    logits = jax.random.normal(k_x, (N, vocab_size), dtype=jnp.float32)
    x = jax.nn.log_softmax(logits, axis=-1)   # module expects log-probs
    target = jax.random.randint(k_t, (N,), 0, vocab_size, dtype=jnp.int32)
    target = target.at[3].set(padding_idx).at[11].set(padding_idx)  # pad rows

    loss = jax.block_until_ready(label_smoothing_loss(
        x, target, vocab_size=vocab_size, padding_idx=padding_idx,
        smoothing=smoothing))
    ref = _reference_loss(x, target, vocab_size=vocab_size,
                          padding_idx=padding_idx, smoothing=smoothing)
    assert jnp.allclose(loss, ref, rtol=1e-5, atol=1e-3), (loss, ref)

    # --- Case 2: bf16 log-probs (MXU reduction path, f32 accumulation) -----
    loss_bf16 = jax.block_until_ready(label_smoothing_loss(
        x.astype(jnp.bfloat16), target, vocab_size=vocab_size,
        padding_idx=padding_idx, smoothing=smoothing))
    assert jnp.allclose(loss_bf16, ref, rtol=5e-2, atol=0.5), (loss_bf16, ref)

    # --- Case 3: exercise vocab tiling, partial (masked) last vocab tile and
    #             padded rows (tiny tiles forced via row_tile / vocab_tile) --
    vocab_size3, n3 = 320, 12
    k_x3, k_t3 = jax.random.split(jax.random.PRNGKey(1))
    x3 = jax.nn.log_softmax(
        jax.random.normal(k_x3, (n3, vocab_size3), dtype=jnp.float32), axis=-1)
    target3 = jax.random.randint(k_t3, (n3,), 0, vocab_size3, dtype=jnp.int32)
    target3 = target3.at[2].set(padding_idx)
    loss3 = jax.block_until_ready(label_smoothing_loss(
        x3, target3, vocab_size=vocab_size3, padding_idx=padding_idx,
        smoothing=smoothing, row_tile=8, vocab_tile=128))
    ref3 = _reference_loss(x3, target3, vocab_size=vocab_size3,
                           padding_idx=padding_idx, smoothing=smoothing)
    assert jnp.allclose(loss3, ref3, rtol=1e-5, atol=1e-3), (loss3, ref3)

    print("KERNEL_OK")
</pallas_src>

<mosaic_0001>
module attributes {stable_mosaic.version = 11 : i64} {
  func.func @_label_smoothing_kernel(%arg0: i32, %arg1: i32, %arg2: memref<8x128xf32, #tpu.memory_space<vmem>>, %arg3: memref<8x1xi32, #tpu.memory_space<vmem>>, %arg4: memref<8x1xf32, #tpu.memory_space<vmem>>, %arg5: memref<8x128xf32, #tpu.memory_space<vmem>>) attributes {dimension_semantics = [#tpu.dimension_semantics<parallel>, #tpu.dimension_semantics<arbitrary>], iteration_bounds = array<i64: 2, 1>, scalar_prefetch = 0 : i64, scratch_operands = 1 : i64, tpu.core_type = #tpu.core_type<tc>, window_params = [{transform_indices = @transform_0, window_bounds = array<i64: 8, 128>}, {transform_indices = @transform_1, window_bounds = array<i64: 8, 1>}, {transform_indices = @transform_2, window_bounds = array<i64: 8, 1>}]} {
    %c0_i32 = arith.constant 0 : i32
    %0 = arith.cmpi eq, %arg1, %c0_i32 : i32
    %1 = arith.extui %0 : i1 to i32
    %c0_i32_0 = arith.constant 0 : i32
    %2 = arith.cmpi ne, %1, %c0_i32_0 : i32
    scf.if %2 {
      %cst_16 = arith.constant 0.000000e+00 : f32
      %32 = vector.broadcast %cst_16 : f32 to vector<8x128xf32>
      %c0_17 = arith.constant 0 : index
      %c0_18 = arith.constant 0 : index
      %33 = vector.load %arg5[%c0_17, %c0_18] : memref<8x128xf32, #tpu.memory_space<vmem>>, vector<8x128xf32>
      tpu.vector_store %arg5[%c0_17, %c0_18], %32 {strides = array<i32>} : memref<8x128xf32, #tpu.memory_space<vmem>>, vector<8x128xf32>,
    } else {
    }
    %c0 = arith.constant 0 : index
    %c0_1 = arith.constant 0 : index
    %3 = vector.load %arg2[%c0, %c0_1] : memref<8x128xf32, #tpu.memory_space<vmem>>, vector<8x128xf32>
    %c0_2 = arith.constant 0 : index
    %c0_3 = arith.constant 0 : index
    %4 = vector.load %arg3[%c0_2, %c0_3] : memref<8x1xi32, #tpu.memory_space<vmem>>, vector<8x1xi32>
    %5 = tpu.iota {dimensions = array<i32: 1>} : vector<8x128xi32>
    %c128_i32 = arith.constant 128 : i32
    %6 = arith.muli %arg1, %c128_i32 : i32
    %7 = vector.broadcast %6 : i32 to vector<8x1xi32>
    %8 = arith.subi %4, %7 : vector<8x1xi32>
    %9 = vector.broadcast %8 : vector<8x1xi32> to vector<8x128xi32>
    %10 = arith.cmpi eq, %5, %9 : vector<8x128xi32>
    %cst = arith.constant 0.000000e+00 : f32
    %11 = vector.broadcast %cst : f32 to vector<8x128xf32>
    %12 = arith.select %10, %3, %11 : vector<8x128xi1>, vector<8x128xf32>
    %cst_4 = arith.constant dense<0.000000e+00> : vector<8xf32>
    %13 = vector.multi_reduction <add>, %12, %cst_4 [1] : vector<8x128xf32> to vector<8xf32>
    %14 = vector.shape_cast %13 : vector<8xf32> to vector<8x1xf32>
    %cst_5 = arith.constant -0.89920634 : f32
    %15 = vector.broadcast %cst_5 : f32 to vector<8x1xf32>
    %16 = arith.mulf %15, %14 : vector<8x1xf32>
    %cst_6 = arith.constant dense<0.000000e+00> : vector<8xf32>
    %17 = vector.multi_reduction <add>, %3, %cst_6 [1] : vector<8x128xf32> to vector<8xf32>
    %18 = vector.shape_cast %17 : vector<8xf32> to vector<8x1xf32>
    %cst_7 = arith.constant 7.93650805E-4 : f32
    %19 = vector.broadcast %cst_7 : f32 to vector<8x1xf32>
    %20 = arith.mulf %19, %18 : vector<8x1xf32>
    %21 = arith.subf %16, %20 : vector<8x1xf32>
    %c0_8 = arith.constant 0 : index
    %c0_9 = arith.constant 0 : index
    %22 = vector.load %arg5[%c0_8, %c0_9] : memref<8x128xf32, #tpu.memory_space<vmem>>, vector<8x128xf32>
    %23 = vector.broadcast %21 : vector<8x1xf32> to vector<8x128xf32>
    %24 = arith.addf %22, %23 : vector<8x128xf32>
    %c0_10 = arith.constant 0 : index
    %c0_11 = arith.constant 0 : index
    %25 = vector.load %arg5[%c0_10, %c0_11] : memref<8x128xf32, #tpu.memory_space<vmem>>, vector<8x128xf32>
    tpu.vector_store %arg5[%c0_10, %c0_11], %24 {strides = array<i32>} : memref<8x128xf32, #tpu.memory_space<vmem>>, vector<8x128xf32>,
    %c0_i32_12 = arith.constant 0 : i32
    %26 = arith.cmpi eq, %arg1, %c0_i32_12 : i32
    %27 = arith.extui %26 : i1 to i32
    %c0_i32_13 = arith.constant 0 : i32
    %28 = arith.cmpi ne, %27, %c0_i32_13 : i32
    scf.if %28 {
      %32 = vector.extract_strided_slice %3 {offsets = [0, 0], sizes = [8, 1], strides = [1, 1]} : vector<8x128xf32> to vector<8x1xf32>
      %c0_16 = arith.constant 0 : index
      %c0_17 = arith.constant 0 : index
      %33 = vector.load %arg5[%c0_16, %c0_17] : memref<8x128xf32, #tpu.memory_space<vmem>>, vector<8x128xf32>
      %cst_18 = arith.constant 7.93650805E-4 : f32
      %34 = vector.broadcast %cst_18 : f32 to vector<8x1xf32>
      %35 = arith.mulf %34, %32 : vector<8x1xf32>
      %36 = vector.broadcast %35 : vector<8x1xf32> to vector<8x128xf32>
      %37 = arith.addf %33, %36 : vector<8x128xf32>
      %c0_19 = arith.constant 0 : index
      %c0_20 = arith.constant 0 : index
      %38 = vector.load %arg5[%c0_19, %c0_20] : memref<8x128xf32, #tpu.memory_space<vmem>>, vector<8x128xf32>
      tpu.vector_store %arg5[%c0_19, %c0_20], %37 {strides = array<i32>} : memref<8x128xf32, #tpu.memory_space<vmem>>, vector<8x128xf32>,
    } else {
    }
    %c0_i32_14 = arith.constant 0 : i32
    %29 = arith.cmpi eq, %arg1, %c0_i32_14 : i32
    %30 = arith.extui %29 : i1 to i32
    %c0_i32_15 = arith.constant 0 : i32
    %31 = arith.cmpi ne, %30, %c0_i32_15 : i32
    scf.if %31 {
      %c0_i32_16 = arith.constant 0 : i32
      %32 = vector.broadcast %c0_i32_16 : i32 to vector<8x1xi32>
      %33 = arith.cmpi ne, %4, %32 : vector<8x1xi32>
      %c0_17 = arith.constant 0 : index
      %c0_18 = arith.constant 0 : index
      %34 = vector.load %arg5[%c0_17, %c0_18] : memref<8x128xf32, #tpu.memory_space<vmem>>, vector<8x1xf32>
      %cst_19 = arith.constant -0.808711171 : f32
      %35 = vector.broadcast %cst_19 : f32 to vector<8x1xf32>
      %36 = arith.addf %34, %35 : vector<8x1xf32>
      %cst_20 = arith.constant 0.000000e+00 : f32
      %37 = vector.broadcast %cst_20 : f32 to vector<8x1xf32>
      %38 = arith.select %33, %36, %37 : vector<8x1xi1>, vector<8x1xf32>
      %c0_21 = arith.constant 0 : index
      %c0_22 = arith.constant 0 : index
      %39 = vector.load %arg4[%c0_21, %c0_22] : memref<8x1xf32, #tpu.memory_space<vmem>>, vector<8x1xf32>
      tpu.vector_store %arg4[%c0_21, %c0_22], %38 {strides = array<i32>} : memref<8x1xf32, #tpu.memory_space<vmem>>, vector<8x1xf32>,
    } else {
    }
    return
  }
  func.func @transform_0(%arg0: i32, %arg1: i32) -> (i32, i32) {
    %c0_i32 = arith.constant 0 : i32
    return %arg0, %arg1 : i32, i32
  }
  func.func @transform_1(%arg0: i32, %arg1: i32) -> (i32, i32) {
    %c0_i32 = arith.constant 0 : i32
    %c0_i32_0 = arith.constant 0 : i32
    return %arg0, %c0_i32 : i32, i32
  }
  func.func @transform_2(%arg0: i32, %arg1: i32) -> (i32, i32) {
    %c0_i32 = arith.constant 0 : i32
    %c0_i32_0 = arith.constant 0 : i32
    return %arg0, %c0_i32 : i32, i32
  }
}

</mosaic_0001>

<bundles_post_ra>
// kernel: tpu_custom_call.1
= control target key start
LH: loop header
LB: loop body
LE: loop exit
PB: predicated region body
PF: predicated region fallthrough
CT: control target
= control target key end

     0   :  { %s377_s9 = smov 0   ;;  %s379_s10 = smov 0   ;;  %s413_s0 = inlined_call_operand.vmem [shape: f32[16,128], index: 0, kind: input, shape index: {}]   ;;  %s414_s1 = inlined_call_operand.vmem [shape: s32[16,1], index: 1, kind: input, shape index: {}]   ;;  %s415_s2 = inlined_call_operand.vmem [shape: f32[16,1], index: 2, kind: output, shape index: {}]  }
   0x1   :  { %s381_s11 = smov 0  }
   0x2 LB: > { %s24_s12 = sadd.s32 1, %s355_s10  ;;  %p304_p0 = scmp.ge.s32.totalorder %s359_s11, 1  ;;  %s359_s11 = sphi %s381_s11, %s12_s11   ;;  %s355_s10 = sphi %s379_s10, %s417_s10   ;;  %s351_s9 = sphi %s377_s9, %s416_s9  }
   0x3   : > { %p26_p1 = scmp.ge.s32.totalorder %s24_s12, 2  ;;  %p137_p2 = scmp.lt.s32.totalorder %s359_s11, 3 }
   0x5   : > { %s419_s12 = smov (%p26_p1, %s24_s12), 0  ;;  %p138_p3 = pnand %p304_p0, %p137_p2 }
   0x6   : > { %p164_p4 = scmp.lt.s32.totalorder (!%p138_p3), %s351_s9, 1  ;;  %v361_v0 = vmov (!%p138_p3), 0   ;;  %v186_v4 = vlaneseq (!%p138_p3)  ;;  %vm222_vm2 = vcmask (!%p138_p3), 7168  }
   0x7   : > { %141 = sbr.rel (%p138_p3) target bundleno = 300 (0x12c), region = 28  ;;  %335 = vset.pattern.permute.xlu0 (!%p138_p3), %v361_v0  ;;  %336 = vset.pattern.permute.xlu1 (!%p138_p3), %v361_v0 }
   0x8   : > { %v187_v5 = vand.u32 (!%p138_p3), 127, %v186_v4 }
   0xe   : > { %s421_s9 = smov (!%p164_p4, %s351_s9), 1 }
   0xf   : > { %s305_s13 = sshll.u32 %s421_s9, 3 }
  0x10   : > { %s174_s16 = scalar_lea.vmem %s414_s1, %s305_s13  ;;  %s170_s19 = scalar_lea.vmem %s413_s0, %s305_s13 }
  0x11   : > { %v185_v1 = vld [vmem:[%s174_s16] sm:$0xff]  ;;  %s178_s22 = scalar_lea.vmem %s415_s2, %s305_s13 }
  0x12   : > { %192 = vperm.xlu0 %335, %v185_v1   ;;  %v184_v2 = vld [vmem:[%s170_s19] sm:$0xff]  ;;  %vm218_vm1 = vcmp.ne.s32.totalorder %v185_v1, 0 }
  0x13   : > { %199 = vadd.xlane.f32.xlu1 %v184_v2  ;;  %v210_v3 = vmul.f32 0.0007936508, %v184_v2 }
  0x24   : > { %213 = vperm.xlu1 %336, %v210_v3  }
  0x91   : > { %v193_v6 = vpop.permute.xlu0 %192 }
  0x92   : > { %vm194_vm0 = vcmp.eq.s32.totalorder %v187_v5, %v193_v6 }
  0x93   : > { %v195_v7 = vsel %vm194_vm0, %v184_v2, 0.0 }
  0x94   : > { %196 = vadd.xlane.f32.xlu0 %v195_v7 }
  0xa0   : > { %v200_v8 = vpop.xlane.xlu1 %199 }
  0xa1   : > { %v201_v9 = vmul.f32 0.0007936508, %v200_v8 }
  0xa4   : > { %v214_v12 = vpop.permute.xlu1 %213 }
 0x121   : > { %v197_v10 = vpop.xlane.xlu0 %196 }
 0x122   : > { %v198_v11 = vmul.f32 -0.89920634, %v197_v10 }
 0x124   : > { %v202_v13 = vsub.f32 %v198_v11, %v201_v9 }
 0x126   : > { %v216_v14 = vadd.f32 %v214_v12, %v202_v13 }
 0x128   : > { %v220_v15 = vadd.f32 -0.8087112, %v216_v14 }
 0x12a   : > { %v221_v16 = vsel %vm218_vm1, %v220_v15, 0.0 }
 0x12b   : > { %223 = vst.msk [vmem:[%s178_s22] sm:$0xff] %vm222_vm2, %v221_v16 }
 0x12c PF: > { %s12_s11 = sadd.s32 1, %s359_s11   ;;  %s416_s9 = smov %s355_s10 }
 0x12d   : > { %p9_p5 = scmp.ge.s32.totalorder %s12_s11, 4   ;;  %s417_s10 = smov %s419_s12 }
 0x12f   :  { %11 = sbr.rel (!%p9_p5) target bundleno = 2 (0x2), region = 69 }

</bundles_post_ra>
